<compile_context>
chip_gen: v7x
topology: tpu7x:2x2x1
jax: 0.10.0
libtpu: 0.0.40
codegen_flags: <defaults>
</compile_context>

<pallas_src>
import functools
from typing import NamedTuple, Optional

import jax
import jax.numpy as jnp
from jax.experimental import pallas as pl
from jax.experimental.pallas import tpu as pltpu


class EmbedReturn(NamedTuple):
    emb: Optional[jax.Array] = None
    time_emb: Optional[jax.Array] = None
    style: Optional[jax.Array] = None


def _time_embed_kernel(x_ref, w1_ref, b1_ref, w2_ref, b2_ref, o_ref, *, compute_dtype):
    # Linear -> SiLU -> Linear.  MXU operands in `compute_dtype` (bf16 by default),
    # accumulation / bias / SiLU in f32.
    x = x_ref[...].astype(compute_dtype)
    h = jnp.dot(x, w1_ref[...], preferred_element_type=jnp.float32)
    h = h + b1_ref[...].astype(jnp.float32)          # (1, To) sublane broadcast
    h = h * jax.nn.sigmoid(h)                        # SiLU in f32 (EUP handles sigmoid)
    y = jnp.dot(h.astype(compute_dtype), w2_ref[...], preferred_element_type=jnp.float32)
    y = y + b2_ref[...].astype(jnp.float32)
    o_ref[...] = y.astype(o_ref.dtype)


def time_embed_mlp(time_emb, w1, b1, w2, b2, *, block_b=4096, small_batch_max=4096,
                   out_dtype=None, compute_dtype=jnp.bfloat16):
    """[B, Tc] @ [Tc, To] -> SiLU -> @ [To, To] (+ biases) -> [B, To]."""
    B, Tc = time_emb.shape
    To = w1.shape[1]
    if out_dtype is None:
        out_dtype = time_emb.dtype
    out_shape = jax.ShapeDtypeStruct((B, To), out_dtype)

    b1 = b1.reshape(1, To)
    b2 = b2.reshape(1, To)

    kernel = functools.partial(_time_embed_kernel, compute_dtype=compute_dtype)

    itemsize = lambda a: a.size * a.dtype.itemsize
    cost = pl.CostEstimate(
        flops=2 * B * Tc * To + 2 * B * To * To,
        transcendentals=B * To,
        bytes_accessed=(itemsize(time_emb) + itemsize(w1) + itemsize(w2)
                        + itemsize(b1) + itemsize(b2)
                        + B * To * jnp.dtype(out_dtype).itemsize),
    )

    if B <= small_batch_max:
        # Small batch: gridless call, full-array blocks resident in VMEM.
        # (At B<=4096 f32 the lane-padded x tile + out tile are ~4 MiB total.)
        vmem_spec = pl.BlockSpec(memory_space=pltpu.MemorySpace.VMEM)
        return pl.pallas_call(
            kernel,
            out_shape=out_shape,
            in_specs=[vmem_spec] * 5,
            out_specs=vmem_spec,
            cost_estimate=cost,
        )(time_emb, w1, b1, w2, b2)

    # Large batch: tile rows of the batch with a cdiv grid (ragged last block is
    # masked by Pallas; rows are independent so garbage pad rows are harmless).
    # Clamp the tile so the grid has >= 2 blocks (megacore sharding on v7x).
    # VMEM note (v7x, 64 MiB physical / 32 MiB scoped): count the x tile at its
    # lane-padded size — (bb, 32) f32 occupies bb*128*4 bytes in VMEM.
    bb = min(block_b, max(8, ((B // 2) // 8) * 8))
    grid = (pl.cdiv(B, bb),)
    return pl.pallas_call(
        kernel,
        out_shape=out_shape,
        grid=grid,
        in_specs=[
            pl.BlockSpec((bb, Tc), lambda i: (i, 0)),
            pl.BlockSpec((Tc, To), lambda i: (0, 0)),   # weights resident
            pl.BlockSpec((1, To), lambda i: (0, 0)),
            pl.BlockSpec((To, To), lambda i: (0, 0)),
            pl.BlockSpec((1, To), lambda i: (0, 0)),
        ],
        out_specs=pl.BlockSpec((bb, To), lambda i: (i, 0)),
        compiler_params=pltpu.CompilerParams(
            dimension_semantics=("parallel",),
        ),
        cost_estimate=cost,
    )(time_emb, w1, b1, w2, b2)


def time_style_seperate_embed_forward(params, time_emb=None, cond=None):
    """Mirrors TimeStyleSeperateEmbed.forward semantics exactly."""
    if time_emb is None:
        te = None
    else:
        te = time_embed_mlp(time_emb, params["w1"], params["b1"],
                            params["w2"], params["b2"])
    style = cond  # nn.Identity
    return EmbedReturn(emb=style, time_emb=te, style=style)


def init_params(key, time_channels, time_out_channels,
                weight_dtype=jnp.bfloat16, bias_dtype=jnp.float32):
    k1, k2, k3, k4 = jax.random.split(key, 4)
    # Deterministic synthetic init (not a checkpoint load).  Weights stored bf16
    # so both matmuls run MXU-native; biases stay f32 (added post-accumulation).
    w1 = (jax.random.normal(k1, (time_channels, time_out_channels), jnp.float32)
          * 0.02).astype(weight_dtype)
    b1 = (jax.random.normal(k2, (time_out_channels,), jnp.float32) * 0.02
          ).astype(bias_dtype)
    w2 = (jax.random.normal(k3, (time_out_channels, time_out_channels), jnp.float32)
          * 0.02).astype(weight_dtype)
    b2 = (jax.random.normal(k4, (time_out_channels,), jnp.float32) * 0.02
          ).astype(bias_dtype)
    return {"w1": w1, "b1": b1, "w2": w2, "b2": b2}


def _reference(params, time_emb):
    # Pure-JAX f32 reference (weights upcast).  The kernel does its matmuls with
    # bf16 MXU operands, so comparisons use a loosened tolerance.
    w1 = params["w1"].astype(jnp.float32)
    w2 = params["w2"].astype(jnp.float32)
    h = time_emb.astype(jnp.float32) @ w1 + params["b1"]
    h = h * jax.nn.sigmoid(h)
    return h @ w2 + params["b2"]


if __name__ == "__main__":
    time_channels = 32
    time_out_channels = 128  # lane-dense output (multiple of 128)

    key = jax.random.PRNGKey(0)
    kp, kt, kc, kt2 = jax.random.split(key, 4)

    params = init_params(kp, time_channels, time_out_channels)

    # --- small-batch path (gridless, fully VMEM-resident) ---
    B = 8
    time_emb = jax.random.normal(kt, (B, time_channels), jnp.float32)
    cond = jax.random.normal(kc, (B, time_out_channels), jnp.float32)

    out = time_style_seperate_embed_forward(params, time_emb=time_emb, cond=cond)
    jax.block_until_ready(out.time_emb)
    jax.block_until_ready(out.style)

    y_ref = _reference(params, time_emb)
    # bf16 MXU operands -> loosened tolerance vs. the f32 reference.
    assert jnp.allclose(out.time_emb.astype(jnp.float32), y_ref, atol=2e-2, rtol=2e-2)
    assert out.style is cond and out.emb is cond

    # time_emb=None branch (module semantics)
    out_none = time_style_seperate_embed_forward(params, time_emb=None, cond=cond)
    assert out_none.time_emb is None and out_none.style is cond

    # --- tiled cdiv-grid path (ragged last block, parallel batch axis) ---
    B2 = 272  # not a multiple of the tile -> exercises the ragged last block
    time_emb2 = jax.random.normal(kt2, (B2, time_channels), jnp.float32)
    y2 = time_embed_mlp(time_emb2, params["w1"], params["b1"],
                        params["w2"], params["b2"],
                        block_b=128, small_batch_max=0)
    jax.block_until_ready(y2)
    y2_ref = _reference(params, time_emb2)
    assert jnp.allclose(y2.astype(jnp.float32), y2_ref, atol=2e-2, rtol=2e-2)

    print("KERNEL_OK")
</pallas_src>

<mosaic_0001>
module attributes {stable_mosaic.version = 11 : i64} {
  func.func @_time_embed_kernel(%arg0: memref<8x32xf32, #tpu.memory_space<vmem>>, %arg1: memref<32x128xbf16, #tpu.memory_space<vmem>>, %arg2: memref<1x128xf32, #tpu.memory_space<vmem>>, %arg3: memref<128x128xbf16, #tpu.memory_space<vmem>>, %arg4: memref<1x128xf32, #tpu.memory_space<vmem>>, %arg5: memref<8x128xf32, #tpu.memory_space<vmem>>) attributes {dimension_semantics = [], scalar_prefetch = 0 : i64, scratch_operands = 0 : i64, tpu.core_type = #tpu.core_type<tc>} {
    %c0 = arith.constant 0 : index
    %c0_0 = arith.constant 0 : index
    %0 = vector.load %arg0[%c0, %c0_0] : memref<8x32xf32, #tpu.memory_space<vmem>>, vector<8x32xf32>
    %1 = arith.truncf %0 : vector<8x32xf32> to vector<8x32xbf16>
    %c0_1 = arith.constant 0 : index
    %c0_2 = arith.constant 0 : index
    %2 = vector.load %arg1[%c0_1, %c0_2] : memref<32x128xbf16, #tpu.memory_space<vmem>>, vector<32x128xbf16>
    %cst = arith.constant dense<0.000000e+00> : vector<8x128xf32>
    %3 = tpu.matmul %1, %2, %cst {dimension_numbers = #tpu.dot_dimension_numbers<[1], [0], [0], [1], [0, 0, 1, 1], [], []>} : vector<8x32xbf16>, vector<32x128xbf16>, vector<8x128xf32> -> vector<8x128xf32>
    %c0_3 = arith.constant 0 : index
    %c0_4 = arith.constant 0 : index
    %4 = vector.load %arg2[%c0_3, %c0_4] : memref<1x128xf32, #tpu.memory_space<vmem>>, vector<1x128xf32>
    %5 = vector.broadcast %4 : vector<1x128xf32> to vector<8x128xf32>
    %6 = arith.addf %3, %5 : vector<8x128xf32>
    %7 = arith.negf %6 : vector<8x128xf32>
    %8 = math.exp %7 : vector<8x128xf32>
    %cst_5 = arith.constant 1.000000e+00 : f32
    %9 = vector.broadcast %cst_5 : f32 to vector<8x128xf32>
    %10 = arith.addf %9, %8 : vector<8x128xf32>
    %11 = arith.divf %9, %10 : vector<8x128xf32>
    %12 = arith.mulf %6, %11 : vector<8x128xf32>
    %13 = arith.truncf %12 : vector<8x128xf32> to vector<8x128xbf16>
    %c0_6 = arith.constant 0 : index
    %c0_7 = arith.constant 0 : index
    %14 = vector.load %arg3[%c0_6, %c0_7] : memref<128x128xbf16, #tpu.memory_space<vmem>>, vector<128x128xbf16>
    %cst_8 = arith.constant dense<0.000000e+00> : vector<8x128xf32>
    %15 = tpu.matmul %13, %14, %cst_8 {dimension_numbers = #tpu.dot_dimension_numbers<[1], [0], [0], [1], [0, 0, 1, 1], [], []>} : vector<8x128xbf16>, vector<128x128xbf16>, vector<8x128xf32> -> vector<8x128xf32>
    %c0_9 = arith.constant 0 : index
    %c0_10 = arith.constant 0 : index
    %16 = vector.load %arg4[%c0_9, %c0_10] : memref<1x128xf32, #tpu.memory_space<vmem>>, vector<1x128xf32>
    %17 = vector.broadcast %16 : vector<1x128xf32> to vector<8x128xf32>
    %18 = arith.addf %15, %17 : vector<8x128xf32>
    %c0_11 = arith.constant 0 : index
    %c0_12 = arith.constant 0 : index
    %19 = vector.load %arg5[%c0_11, %c0_12] : memref<8x128xf32, #tpu.memory_space<vmem>>, vector<8x128xf32>
    tpu.vector_store %arg5[%c0_11, %c0_12], %18 {strides = array<i32>} : memref<8x128xf32, #tpu.memory_space<vmem>>, vector<8x128xf32>,
    return
  }
}

</mosaic_0001>

<bundles_post_ra>
// kernel: tpu_custom_call.1
= control target key start
LH: loop header
LB: loop body
LE: loop exit
PB: predicated region body
PF: predicated region fallthrough
CT: control target
= control target key end

     0   :  { %10 = vsyncpa [#allocation3], 0  ;;  %s534_s0 = inlined_call_operand.hbm [shape: f32[8,32], index: 0, kind: input, shape index: {}]   ;;  %s535_s1 = inlined_call_operand.hbm [shape: bf16[32,128], index: 1, kind: input, shape index: {}]   ;;  %s536_s2 = inlined_call_operand.vmem [shape: f32[1,128], index: 2, kind: input, shape index: {}]   ;;  %s537_s3 = inlined_call_operand.hbm [shape: bf16[128,128], index: 3, kind: input, shape index: {}]   ;;  %s538_s4 = inlined_call_operand.vmem [shape: f32[1,128], index: 4, kind: input, shape index: {}]   ;;  %s539_s5 = inlined_call_operand.hbm [shape: f32[8,128], index: 5, kind: output, shape index: {}]  }
   0x1   :  { %11 = vsyncpa [#allocation6], 0 }
   0x2   :  { %12 = vsyncpa [#allocation4], 0  ;;  %s436_s18 = smov [#allocation5]   ;;  %s342_s22 = scalar_lea.hbm %s535_s1, 256 }
   0x3   :  { %s28_s19 = sshll.u32 %s436_s18, 4  ;;  %p343_p0 = scmp.ne.s32.totalorder %s535_s1, %s342_s22  ;;  %s29_s19 = int_to_ptr.vmem [resolvable:$true] %s28_s19 }
   0x4   :  { %p346_p1 = scmp.lt.u32.totalorder %s342_s22, %s535_s1 }
   0x6   :  { %p348_p2 = pnand %p346_p1, %p343_p0 }
   0x8   :  { %351 = shalt.err (!%p348_p2)
}
   0x9   :  { %s352_s27 = scalar_lea.vmem %s29_s19, 256  ;;  %p357_p4 = scmp.lt.s32.totalorder %s29_s19, %s29_s19 }
   0xa   :  { %p353_p3 = scmp.ne.s32.totalorder %s29_s19, %s352_s27  ;;  %p358_p5 = scmp.lt.s32.totalorder %s352_s27, %s352_s27 }
   0xc   :  { %p359_p6 = por %p358_p5, %p357_p4 }
   0xe   :  { %p360_p7 = pnand %p359_p6, %p353_p3 }
  0x10   :  { %363 = shalt.err (!%p360_p7)
}
  0x11   :  { %s437_s28 = smov 64   ;;  %s438_s29 = smov 4  }
  0x12   :  { %34 = dma.hbm_to_vmem [thread:$0]  %s535_s1, 256, %s29_s19, [#allocation6], %s437_s28, %s437_s28, %s438_s29  }
  0x13   :  { %s439_s7 = smov [#allocation2]   ;;  %s440_s9 = smov [#allocation7]  }
  0x14   :  { %s19_s8 = sshll.u32 %s439_s7, 4  ;;  %s42_s10 = sshll.u32 %s440_s9, 4  ;;  %s20_s8 = int_to_ptr.vmem [resolvable:$true] %s19_s8  ;;  %s43_s10 = int_to_ptr.vmem [resolvable:$true] %s42_s10 }
  0x15   :  { %s364_s13 = scalar_lea.hbm %s534_s0, 128 }
  0x16   :  { %p365_p8 = scmp.ne.s32.totalorder %s534_s0, %s364_s13  ;;  %p368_p9 = scmp.lt.u32.totalorder %s364_s13, %s534_s0 }
  0x18   :  { %p370_p10 = pnand %p368_p9, %p365_p8 }
  0x1a   :  { %373 = shalt.err (!%p370_p10)
}
  0x1b   :  { %s374_s1 = scalar_lea.vmem %s20_s8, 128  ;;  %p379_p12 = scmp.lt.s32.totalorder %s20_s8, %s20_s8 }
  0x1c   :  { %p375_p11 = scmp.ne.s32.totalorder %s20_s8, %s374_s1  ;;  %p380_p13 = scmp.lt.s32.totalorder %s374_s1, %s374_s1 }
  0x1e   :  { %p381_p0 = por %p380_p13, %p379_p12 }
  0x20   :  { %p382_p1 = pnand %p381_p0, %p375_p11 }
  0x22   :  { %385 = shalt.err (!%p382_p1)
}
  0x23   :  { %22 = dma.hbm_to_vmem [thread:$0]  %s534_s0, 128, %s20_s8, [#allocation3]  }
  0x24   :  { %s386_s22 = scalar_lea.hbm %s537_s3, 1024 }
  0x25   :  { %p387_p2 = scmp.ne.s32.totalorder %s537_s3, %s386_s22  ;;  %p390_p3 = scmp.lt.u32.totalorder %s386_s22, %s537_s3 }
  0x27   :  { %p392_p4 = pnand %p390_p3, %p387_p2 }
  0x29   :  { %395 = shalt.err (!%p392_p4)
}
  0x2a   :  { %s396_s27 = scalar_lea.vmem %s43_s10, 1024  ;;  %p401_p6 = scmp.lt.s32.totalorder %s43_s10, %s43_s10 }
  0x2b   :  { %p397_p5 = scmp.ne.s32.totalorder %s43_s10, %s396_s27  ;;  %p402_p7 = scmp.lt.s32.totalorder %s396_s27, %s396_s27 }
  0x2d   :  { %p403_p8 = por %p402_p7, %p401_p6 }
  0x2f   :  { %p404_p9 = pnand %p403_p8, %p397_p5 }
  0x31   :  { %407 = shalt.err (!%p404_p9)
}
  0x32   :  { %48 = dma.hbm_to_vmem [thread:$0]  %s537_s3, 1024, %s43_s10, [#allocation6], %s437_s28, %s437_s28, %s438_s29  }
  0x33   :  { %430 = dma.done.wait [#allocation3], 128  }
  0x34   :  { %431 = vsyncadd [#allocation3], 4294967168 }
  0x35   :  { %432 = dma.done.wait [#allocation6], 1280  }
  0x36   :  { %433 = vsyncadd [#allocation6], 4294966016  ;;  %v441_v0 = vmov 0.0   ;;  %vm442_vm0 = vmmov 0   ;;  %v328_v1 = vld [vmem:[#allocation5] sm:$0xff]   ;;  %v329_v2 = vld [vmem:[#allocation5 + $0x8] sm:$0xff]  }
  0x37   :  { %292 = vmatprep.subr.bf16.mxu0 %v441_v0  ;;  %296 = vmatprep.mubr.msk.bf16.mxu0 %vm442_vm0, %v441_v0  ;;  %v61_v3 = vld [vmem:[#allocation2] sm:$0xff]  ;;  %vm86_vm1 = vcmask 261120   ;;  %v330_v5 = vld [vmem:[#allocation7] sm:$0xff]   ;;  %v332_v7 = vld [vmem:[#allocation7 + $0x10] sm:$0xff]   ;;  %s443_s7 = smov [#allocation8]  }
  0x38   :  { %300 = vmatprep.subr.bf16.mxu1 %v441_v0  ;;  %316 = vmatprep.mubr.msk.bf16.mxu1 %vm442_vm0, %v441_v0  ;;  %v62_v4 = vpack.c.bf16 %v61_v3, %v61_v3  ;;  %v331_v6 = vld [vmem:[#allocation7 + $0x8] sm:$0xff]   ;;  %v333_v8 = vld [vmem:[#allocation7 + $0x18] sm:$0xff]   ;;  %v334_v9 = vld [vmem:[#allocation7 + $0x20] sm:$0xff]  }
  0x39   :  { %293 = vmatpush3.bf16.msra.mxu0 %v328_v1  ;;  %301 = vmatpush3.bf16.msra.mxu1 %v330_v5  ;;  %v335_v10 = vld [vmem:[#allocation7 + $0x28] sm:$0xff]   ;;  %v336_v11 = vld [vmem:[#allocation7 + $0x30] sm:$0xff]   ;;  %v337_v12 = vld [vmem:[#allocation7 + $0x38] sm:$0xff]  }
  0x3a   :  { %294 = vmatprep.subr.bf16.mxu0 %v441_v0  ;;  %302 = vmatprep.subr.bf16.mxu1 %v441_v0  ;;  %v266_v13 = vld [vmem:[%s536_s2] ss:$0 sm:$0xff]  ;;  %s256_s2 = sshll.u32 %s443_s7, 4  ;;  %s257_s2 = int_to_ptr.vmem [resolvable:$true] %s256_s2 }
  0x3b   :  { %v271_v25 = vld [vmem:[%s538_s4] ss:$0 sm:$0xff]  ;;  %s408_s8 = scalar_lea.vmem %s257_s2, 128  ;;  %p413_p11 = scmp.lt.s32.totalorder %s257_s2, %s257_s2 }
  0x3c   :  { %p409_p10 = scmp.ne.s32.totalorder %s257_s2, %s408_s8  ;;  %p414_p12 = scmp.lt.s32.totalorder %s408_s8, %s408_s8 }
  0x3d   :  { %295 = vmatpush3.bf16.msra.mxu0 %v329_v2  ;;  %303 = vmatpush3.bf16.msra.mxu1 %v331_v6 }
  0x3e   :  { %304 = vmatprep.subr.bf16.mxu1 %v441_v0  ;;  %p415_p13 = por %p414_p12, %p413_p11 }
  0x40   :  { %297 = vmatmul.mubr.msk.bf16.vlgmr.msra.gmra.mrb[0].mxu0 %vm86_vm1, %v62_v4  ;;  %p416_p0 = pnand %p415_p13, %p409_p10 }
  0x41   :  { %305 = vmatpush3.bf16.msra.mxu1 %v332_v7 }
  0x42   :  { %306 = vmatprep.subr.bf16.mxu1 %v441_v0 }
  0x45   :  { %307 = vmatpush3.bf16.msra.mxu1 %v333_v8 }
  0x46   :  { %308 = vmatprep.subr.bf16.mxu1 %v441_v0 }
  0x49   :  { %309 = vmatpush3.bf16.msra.mxu1 %v334_v9 }
  0x4a   :  { %310 = vmatprep.subr.bf16.mxu1 %v441_v0 }
  0x4d   :  { %311 = vmatpush3.bf16.msra.mxu1 %v335_v10 }
  0x4e   :  { %312 = vmatprep.subr.bf16.mxu1 %v441_v0 }
  0x51   :  { %313 = vmatpush3.bf16.msra.mxu1 %v336_v11 }
  0x52   :  { %314 = vmatprep.subr.bf16.mxu1 %v441_v0 }
  0x55   :  { %315 = vmatpush3.bf16.msra.mxu1 %v337_v12 }
 0x113   :  { %v124_v14 = vpop.f32.mrb[0].mxu0 }
 0x114   :  { %v125_v15 = vadd.f32 %v266_v13, %v124_v14  ;;  %v298_v16 = vpop.f32.mrb[1].mxu0 }
 0x115   :  { %v127_v17 = vpop.f32.mrb[2].mxu0 }
 0x116   :  { %v270_v18 = vmul.f32 -1.442695, %v125_v15  ;;  %v299_v19 = vpop.f32.mrb[3].mxu0 }
 0x118   :  { %338 = vpow2.f32 %v270_v18 }
 0x122   :  { %v339_v20 = vpop.eup %338 }
 0x123   :  { %v133_v21 = vadd.f32 1.0, %v339_v20 }
 0x125   :  { %340 = vrcp.f32 %v133_v21 }
 0x12f   :  { %v341_v22 = vpop.eup %340 }
 0x130   :  { %v136_v23 = vmul.f32 %v341_v22, %v125_v15 }
 0x132   :  { %v137_v24 = vpack.c.bf16 %v136_v23, %v136_v23 }
 0x134   :  { %317 = vmatmul.mubr.bf16.vlgmr.msra.gmra.mrb[0].mxu1 %v137_v24 }
 0x207   :  { %v243_v26 = vpop.f32.mrb[0].mxu1 }
 0x208   :  { %v244_v27 = vadd.f32 %v271_v25, %v243_v26  ;;  %v318_v28 = vpop.f32.mrb[1].mxu1 }
 0x209   :  { %v246_v29 = vpop.f32.mrb[2].mxu1 }
 0x20a   :  { %249 = vst [vmem:[#allocation8] sm:$0xff] %v244_v27  ;;  %v319_v30 = vpop.f32.mrb[3].mxu1 }
 0x20b   :  { %419 = shalt.err (!%p416_p0)
}
 0x20c   :  { %s420_s4 = scalar_lea.hbm %s539_s5, 128 }
 0x20d   :  { %p421_p1 = scmp.ne.s32.totalorder %s539_s5, %s420_s4  ;;  %p424_p2 = scmp.lt.u32.totalorder %s420_s4, %s539_s5 }
 0x20f   :  { %p426_p3 = pnand %p424_p2, %p421_p1 }
 0x211   :  { %429 = shalt.err (!%p426_p3)
}
 0x212   :  { %259 = dma.vmem_to_hbm [thread:$0]  %s257_s2, 128, %s539_s5, [#allocation4]  }
 0x213   :  { %434 = dma.done.wait [#allocation4], 128  }
 0x214   :  { %435 = vsyncadd [#allocation4], 4294967168 }
 0x215   :  { %263 = vsyncpa [#allocation3], 1 }
 0x216   :  { %264 = vsyncpa [#allocation6], 1 }
 0x217   :  { %265 = vsyncpa [#allocation4], 1 }

</bundles_post_ra>
